<compile_context>
chip_gen: v6e
topology: v6e:2x2x1
jax: 0.10.0
libtpu: 0.0.40
codegen_flags: <defaults>
</compile_context>

<pallas_src>
import jax
import jax.numpy as jnp
from jax.experimental import pallas as pl
from jax.experimental.pallas import tpu as pltpu

# ---- DenseBlock configuration (small shapes consistent with the module) ----
N = 16            # batch
L = 16            # sequence length
C0 = 8            # dense-block input channels
G = 32            # growth rate (DenseLayer out_channels)
NUM_LAYERS = 3    # DenseLayers in the block
KSIZE = 3
EPS = 1e-5

LANE_TILE = 128
NL = N * L                                   # lanes = batch folded into length
NUM_LANE_TILES = NL // LANE_TILE
C_IN_MAX = C0 + (NUM_LAYERS - 1) * G         # input channels of the last layer
C_TOTAL = C0 + NUM_LAYERS * G                # channels of the block output

assert NL % LANE_TILE == 0, "batch*length must fill whole 128-lane tiles"
assert LANE_TILE % L == 0, "sequences must not straddle a lane tile"
assert C0 % 8 == 0 and G % 8 == 0, "channel offsets must stay 8-sublane aligned"
assert C_IN_MAX % 8 == 0 and C_TOTAL % 8 == 0


def dense_block_kernel(x_ref, mask_ref, bn_ref, w_ref, b_ref, out_ref):
    # x_ref:    (C0, 128)            block input; lanes = (seq, pos) flattened
    # mask_ref: (2, 128)             row0: pos != 0, row1: pos != L-1 ({0,1} f32)
    # bn_ref:   (1, C_IN_MAX, 2)     layer-k folded BN (scale, bias), zero-padded
    # w_ref:    (1, 3, G, C_IN_MAX)  layer-k conv weight, tap-major, zero-padded
    # b_ref:    (1, G, 1)            layer-k conv bias
    # out_ref:  (C_TOTAL, 128)       resident feature slab == final concat output
    k = pl.program_id(1)

    # Layer 0: initialize the resident slab -> zeros everywhere (so padded /
    # not-yet-written channels are exactly 0) and x in rows [0, C0).
    @pl.when(k == 0)
    def _init():
        out_ref[...] = jnp.zeros_like(out_ref)
        out_ref[0:C0, :] = x_ref[...]

    # Eval-mode BatchNorm + ReLU on the VPU over the fixed-size slab prefix.
    # Channels >= this layer's real input width have scale = bias = 0 -> y = 0,
    # and their weight columns are also 0, so they contribute nothing.
    bn = bn_ref[0]                                          # (C_IN_MAX, 2)
    feat = out_ref[0:C_IN_MAX, :]                           # (C_IN_MAX, 128)
    y = jnp.maximum(feat * bn[:, 0:1] + bn[:, 1:2], 0.0)

    # k=3 / pad=1 conv neighbours via XLU lane rotation; the precomputed {0,1}
    # masks supply the zero padding at every per-sequence boundary and block
    # cross-sequence leakage (no padded buffer, no per-step iota).
    left_ok = jnp.broadcast_to(mask_ref[0:1, :], y.shape)
    right_ok = jnp.broadcast_to(mask_ref[1:2, :], y.shape)
    y_m1 = pltpu.roll(y, shift=1, axis=1) * left_ok                # y[:, l-1]
    y_p1 = pltpu.roll(y, shift=LANE_TILE - 1, axis=1) * right_ok   # y[:, l+1]

    # 3 conv taps = 3 accumulated MXU dots (no sublane-misaligned im2col
    # concatenate); conv bias is a VPU broadcast-add.
    w = w_ref[0]                                            # (3, G, C_IN_MAX)
    acc = jnp.dot(w[0], y_m1, preferred_element_type=jnp.float32)
    acc = acc + jnp.dot(w[1], y, preferred_element_type=jnp.float32)
    acc = acc + jnp.dot(w[2], y_p1, preferred_element_type=jnp.float32)
    acc = acc + b_ref[0]                                    # (G, 1) broadcast

    # In-kernel channel concat: layer k's output lands at rows C0 + k*G.
    # Unrolled static (8-aligned) stores; only one branch executes per step.
    for kk in range(NUM_LAYERS):
        @pl.when(k == kk)
        def _store(kk=kk):
            out_ref[C0 + kk * G:C0 + (kk + 1) * G, :] = acc.astype(out_ref.dtype)


def _pack_params(params):
    """Zero-pad every layer's params to the last layer's channel width."""
    bn_list, w_list, b_list = [], [], []
    for k, (gamma, beta, mean, var, w, b) in enumerate(params):
        ck = C0 + k * G
        scale = gamma / jnp.sqrt(var + EPS)
        bias = beta - mean * scale
        bn_k = jnp.stack([scale, bias], axis=1).astype(jnp.float32)        # (ck, 2)
        bn_list.append(jnp.pad(bn_k, ((0, C_IN_MAX - ck), (0, 0))))
        w_k = jnp.transpose(w, (2, 0, 1)).astype(jnp.float32)              # (3, G, ck)
        w_list.append(jnp.pad(w_k, ((0, 0), (0, 0), (0, C_IN_MAX - ck))))
        b_list.append(b.reshape(G, 1).astype(jnp.float32))
    return (jnp.stack(bn_list, 0),      # (NUM_LAYERS, C_IN_MAX, 2)
            jnp.stack(w_list, 0),       # (NUM_LAYERS, 3, G, C_IN_MAX)
            jnp.stack(b_list, 0))       # (NUM_LAYERS, G, 1)


@jax.jit
def dense_block(x, params):
    n, c_in, length = x.shape
    assert (n, c_in, length) == (N, C0, L)
    bn_p, w_p, b_p = _pack_params(params)

    # Lane-dense activation slab: lanes = n*L + l; every lane is real data.
    x2d = jnp.transpose(x, (1, 0, 2)).reshape(C0, NL).astype(jnp.float32)

    # Constant per-sequence boundary masks (computed once, DMA'd once).
    pos = jnp.arange(LANE_TILE, dtype=jnp.int32) % L
    masks = jnp.stack([pos != 0, pos != L - 1], axis=0).astype(jnp.float32)

    out2d = pl.pallas_call(
        dense_block_kernel,
        out_shape=jax.ShapeDtypeStruct((C_TOTAL, NL), jnp.float32),
        grid_spec=pltpu.PrefetchScalarGridSpec(
            num_scalar_prefetch=0,
            grid=(NUM_LANE_TILES, NUM_LAYERS),          # (parallel, arbitrary)
            in_specs=[
                pl.BlockSpec((C0, LANE_TILE), lambda t, k: (0, t)),
                pl.BlockSpec((2, LANE_TILE), lambda t, k: (0, 0)),
                pl.BlockSpec((1, C_IN_MAX, 2), lambda t, k: (k, 0, 0)),
                pl.BlockSpec((1, KSIZE, G, C_IN_MAX), lambda t, k: (k, 0, 0, 0)),
                pl.BlockSpec((1, G, 1), lambda t, k: (k, 0, 0)),
            ],
            out_specs=pl.BlockSpec((C_TOTAL, LANE_TILE), lambda t, k: (0, t)),
        ),
        compiler_params=pltpu.CompilerParams(
            dimension_semantics=("parallel", "arbitrary")),
    )(x2d, masks, bn_p, w_p, b_p)

    # Un-flatten lanes back to (N, C_TOTAL, L); the channel concat was done
    # in-kernel, so this is the only wrapper-side layout op.
    return jnp.transpose(out2d.reshape(C_TOTAL, N, L), (1, 0, 2))


def reference(x, params):
    # Pure-JAX reference mirroring the PyTorch eval-mode DenseBlock forward.
    feat = x
    for (gamma, beta, mean, var, w, b) in params:
        scale = gamma / jnp.sqrt(var + EPS)
        bias = beta - mean * scale
        y = jnp.maximum(feat * scale[None, :, None] + bias[None, :, None], 0.0)
        conv = jax.lax.conv_general_dilated(
            y, w, window_strides=(1,), padding=((1, 1),),
            dimension_numbers=("NCH", "OIH", "NCH")) + b[None, :, None]
        feat = jnp.concatenate([feat, conv], axis=1)
    return feat


if __name__ == "__main__":
    key = jax.random.PRNGKey(0)
    kx, kp = jax.random.split(key)
    x = jax.random.normal(kx, (N, C0, L), dtype=jnp.float32)

    # Deterministic synthetic per-layer parameters
    # (shapes from nn.BatchNorm1d / nn.Conv1d of each DenseLayer).
    params = []
    pkeys = jax.random.split(kp, NUM_LAYERS)
    for k in range(NUM_LAYERS):
        ck = C0 + k * G
        kg, kb, km, kv, kw, kcb = jax.random.split(pkeys[k], 6)
        gamma = jax.random.normal(kg, (ck,), dtype=jnp.float32) * 0.1 + 1.0
        beta = jax.random.normal(kb, (ck,), dtype=jnp.float32) * 0.1
        mean = jax.random.normal(km, (ck,), dtype=jnp.float32) * 0.1
        var = jax.random.uniform(kv, (ck,), dtype=jnp.float32,
                                 minval=0.5, maxval=1.5)
        w = jax.random.normal(kw, (G, ck, KSIZE), dtype=jnp.float32) * 0.1
        b = jax.random.normal(kcb, (G,), dtype=jnp.float32) * 0.1
        params.append((gamma, beta, mean, var, w, b))
    params = tuple(params)

    out = jax.block_until_ready(dense_block(x, params))
    ref = reference(x, params)

    assert out.shape == (N, C_TOTAL, L), out.shape
    assert jnp.allclose(out, ref, atol=1e-3, rtol=1e-3), "mismatch vs reference"

    print("KERNEL_OK")
</pallas_src>

<mosaic_0001>
module attributes {stable_mosaic.version = 11 : i64} {
  func.func @dense_block_kernel(%arg0: i32, %arg1: i32, %arg2: memref<8x128xf32, #tpu.memory_space<vmem>>, %arg3: memref<2x128xf32, #tpu.memory_space<vmem>>, %arg4: memref<1x72x2xf32, #tpu.memory_space<vmem>>, %arg5: memref<1x3x32x72xf32, #tpu.memory_space<vmem>>, %arg6: memref<1x32x1xf32, #tpu.memory_space<vmem>>, %arg7: memref<104x128xf32, #tpu.memory_space<vmem>>) attributes {dimension_semantics = [#tpu.dimension_semantics<parallel>, #tpu.dimension_semantics<arbitrary>], iteration_bounds = array<i64: 2, 3>, scalar_prefetch = 0 : i64, scratch_operands = 0 : i64, tpu.core_type = #tpu.core_type<tc>, window_params = [{transform_indices = @transform_0, window_bounds = array<i64: 8, 128>}, {pipeline_mode = #tpu.pipeline_mode<synchronous>, transform_indices = @transform_1, window_bounds = array<i64: 2, 128>}, {transform_indices = @transform_2, window_bounds = array<i64: 1, 72, 2>}, {transform_indices = @transform_3, window_bounds = array<i64: 1, 3, 32, 72>}, {transform_indices = @transform_4, window_bounds = array<i64: 1, 32, 1>}, {transform_indices = @transform_5, window_bounds = array<i64: 104, 128>}]} {
    %c0_i32 = arith.constant 0 : i32
    %0 = arith.cmpi eq, %arg1, %c0_i32 : i32
    %1 = arith.extui %0 : i1 to i32
    %c0_i32_0 = arith.constant 0 : i32
    %2 = arith.cmpi ne, %1, %c0_i32_0 : i32
    scf.if %2 {
      %cst_23 = arith.constant 0.000000e+00 : f32
      %50 = vector.broadcast %cst_23 : f32 to vector<104x128xf32>
      %c0_24 = arith.constant 0 : index
      %c0_25 = arith.constant 0 : index
      %51 = vector.load %arg7[%c0_24, %c0_25] : memref<104x128xf32, #tpu.memory_space<vmem>>, vector<104x128xf32>
      tpu.vector_store %arg7[%c0_24, %c0_25], %50 {strides = array<i32>} : memref<104x128xf32, #tpu.memory_space<vmem>>, vector<104x128xf32>,
      %c0_26 = arith.constant 0 : index
      %c0_27 = arith.constant 0 : index
      %52 = vector.load %arg2[%c0_26, %c0_27] : memref<8x128xf32, #tpu.memory_space<vmem>>, vector<8x128xf32>
      %c0_28 = arith.constant 0 : index
      %c0_29 = arith.constant 0 : index
      %53 = vector.load %arg7[%c0_28, %c0_29] : memref<104x128xf32, #tpu.memory_space<vmem>>, vector<8x128xf32>
      tpu.vector_store %arg7[%c0_28, %c0_29], %52 {strides = array<i32>} : memref<104x128xf32, #tpu.memory_space<vmem>>, vector<8x128xf32>,
    } else {
    }
    %c0 = arith.constant 0 : index
    %c0_1 = arith.constant 0 : index
    %c0_2 = arith.constant 0 : index
    %3 = vector.load %arg4[%c0, %c0_1, %c0_2] : memref<1x72x2xf32, #tpu.memory_space<vmem>>, vector<1x72x2xf32>
    %4 = vector.shape_cast %3 : vector<1x72x2xf32> to vector<72x2xf32>
    %c0_3 = arith.constant 0 : index
    %c0_4 = arith.constant 0 : index
    %5 = vector.load %arg7[%c0_3, %c0_4] : memref<104x128xf32, #tpu.memory_space<vmem>>, vector<72x128xf32>
    %6 = vector.extract_strided_slice %4 {offsets = [0, 0], sizes = [72, 1], strides = [1, 1]} : vector<72x2xf32> to vector<72x1xf32>
    %7 = vector.broadcast %6 : vector<72x1xf32> to vector<72x128xf32>
    %8 = arith.mulf %5, %7 : vector<72x128xf32>
    %9 = vector.extract_strided_slice %4 {offsets = [0, 1], sizes = [72, 1], strides = [1, 1]} : vector<72x2xf32> to vector<72x1xf32>
    %10 = vector.broadcast %9 : vector<72x1xf32> to vector<72x128xf32>
    %11 = arith.addf %8, %10 : vector<72x128xf32>
    %cst = arith.constant 0.000000e+00 : f32
    %12 = vector.broadcast %cst : f32 to vector<72x128xf32>
    %13 = arith.maximumf %11, %12 : vector<72x128xf32>
    %c0_5 = arith.constant 0 : index
    %c0_6 = arith.constant 0 : index
    %14 = vector.load %arg3[%c0_5, %c0_6] : memref<2x128xf32, #tpu.memory_space<vmem>>, vector<1x128xf32>
    %15 = vector.shape_cast %14 : vector<1x128xf32> to vector<1x128xf32>
    %16 = vector.broadcast %15 : vector<1x128xf32> to vector<72x128xf32>
    %c1 = arith.constant 1 : index
    %c0_7 = arith.constant 0 : index
    %17 = vector.load %arg3[%c1, %c0_7] : memref<2x128xf32, #tpu.memory_space<vmem>>, vector<1x128xf32>
    %18 = vector.shape_cast %17 : vector<1x128xf32> to vector<1x128xf32>
    %19 = vector.broadcast %18 : vector<1x128xf32> to vector<72x128xf32>
    %c1_i32 = arith.constant 1 : i32
    %20 = tpu.dynamic_rotate %13 by %c1_i32 dim 1 : vector<72x128xf32>, i32 -> vector<72x128xf32>
    %21 = arith.mulf %20, %16 : vector<72x128xf32>
    %c127_i32 = arith.constant 127 : i32
    %22 = tpu.dynamic_rotate %13 by %c127_i32 dim 1 : vector<72x128xf32>, i32 -> vector<72x128xf32>
    %23 = arith.mulf %22, %19 : vector<72x128xf32>
    %c0_8 = arith.constant 0 : index
    %c0_9 = arith.constant 0 : index
    %c0_10 = arith.constant 0 : index
    %c0_11 = arith.constant 0 : index
    %24 = vector.load %arg5[%c0_8, %c0_9, %c0_10, %c0_11] : memref<1x3x32x72xf32, #tpu.memory_space<vmem>>, vector<1x3x32x72xf32>
    %25 = vector.shape_cast %24 : vector<1x3x32x72xf32> to vector<3x32x72xf32>
    %26 = vector.extract_strided_slice %25 {offsets = [0, 0, 0], sizes = [1, 32, 72], strides = [1, 1, 1]} : vector<3x32x72xf32> to vector<1x32x72xf32>
    %27 = vector.shape_cast %26 : vector<1x32x72xf32> to vector<32x72xf32>
    %cst_12 = arith.constant dense<0.000000e+00> : vector<32x128xf32>
    %28 = tpu.matmul %27, %21, %cst_12 {dimension_numbers = #tpu.dot_dimension_numbers<[1], [0], [0], [1], [0, 0, 1, 1], [], []>} : vector<32x72xf32>, vector<72x128xf32>, vector<32x128xf32> -> vector<32x128xf32>
    %29 = vector.extract_strided_slice %25 {offsets = [1, 0, 0], sizes = [1, 32, 72], strides = [1, 1, 1]} : vector<3x32x72xf32> to vector<1x32x72xf32>
    %30 = vector.shape_cast %29 : vector<1x32x72xf32> to vector<32x72xf32>
    %cst_13 = arith.constant dense<0.000000e+00> : vector<32x128xf32>
    %31 = tpu.matmul %30, %13, %cst_13 {dimension_numbers = #tpu.dot_dimension_numbers<[1], [0], [0], [1], [0, 0, 1, 1], [], []>} : vector<32x72xf32>, vector<72x128xf32>, vector<32x128xf32> -> vector<32x128xf32>
    %32 = arith.addf %28, %31 : vector<32x128xf32>
    %33 = vector.extract_strided_slice %25 {offsets = [2, 0, 0], sizes = [1, 32, 72], strides = [1, 1, 1]} : vector<3x32x72xf32> to vector<1x32x72xf32>
    %34 = vector.shape_cast %33 : vector<1x32x72xf32> to vector<32x72xf32>
    %cst_14 = arith.constant dense<0.000000e+00> : vector<32x128xf32>
    %35 = tpu.matmul %34, %23, %cst_14 {dimension_numbers = #tpu.dot_dimension_numbers<[1], [0], [0], [1], [0, 0, 1, 1], [], []>} : vector<32x72xf32>, vector<72x128xf32>, vector<32x128xf32> -> vector<32x128xf32>
    %36 = arith.addf %32, %35 : vector<32x128xf32>
    %c0_15 = arith.constant 0 : index
    %c0_16 = arith.constant 0 : index
    %c0_17 = arith.constant 0 : index
    %37 = vector.load %arg6[%c0_15, %c0_16, %c0_17] : memref<1x32x1xf32, #tpu.memory_space<vmem>>, vector<1x32x1xf32>
    %38 = vector.shape_cast %37 : vector<1x32x1xf32> to vector<32x1xf32>
    %39 = vector.broadcast %38 : vector<32x1xf32> to vector<32x128xf32>
    %40 = arith.addf %36, %39 : vector<32x128xf32>
    %c0_i32_18 = arith.constant 0 : i32
    %41 = arith.cmpi eq, %arg1, %c0_i32_18 : i32
    %42 = arith.extui %41 : i1 to i32
    %c0_i32_19 = arith.constant 0 : i32
    %43 = arith.cmpi ne, %42, %c0_i32_19 : i32
    scf.if %43 {
      %c8 = arith.constant 8 : index
      %c0_23 = arith.constant 0 : index
      %50 = vector.load %arg7[%c8, %c0_23] : memref<104x128xf32, #tpu.memory_space<vmem>>, vector<32x128xf32>
      tpu.vector_store %arg7[%c8, %c0_23], %40 {strides = array<i32>} : memref<104x128xf32, #tpu.memory_space<vmem>>, vector<32x128xf32>,
    } else {
    }
    %c1_i32_20 = arith.constant 1 : i32
    %44 = arith.cmpi eq, %arg1, %c1_i32_20 : i32
    %45 = arith.extui %44 : i1 to i32
    %c0_i32_21 = arith.constant 0 : i32
    %46 = arith.cmpi ne, %45, %c0_i32_21 : i32
    scf.if %46 {
      %c40 = arith.constant 40 : index
      %c0_23 = arith.constant 0 : index
      %50 = vector.load %arg7[%c40, %c0_23] : memref<104x128xf32, #tpu.memory_space<vmem>>, vector<32x128xf32>
      tpu.vector_store %arg7[%c40, %c0_23], %40 {strides = array<i32>} : memref<104x128xf32, #tpu.memory_space<vmem>>, vector<32x128xf32>,
    } else {
    }
    %c2_i32 = arith.constant 2 : i32
    %47 = arith.cmpi eq, %arg1, %c2_i32 : i32
    %48 = arith.extui %47 : i1 to i32
    %c0_i32_22 = arith.constant 0 : i32
    %49 = arith.cmpi ne, %48, %c0_i32_22 : i32
    scf.if %49 {
      %c72 = arith.constant 72 : index
      %c0_23 = arith.constant 0 : index
      %50 = vector.load %arg7[%c72, %c0_23] : memref<104x128xf32, #tpu.memory_space<vmem>>, vector<32x128xf32>
      tpu.vector_store %arg7[%c72, %c0_23], %40 {strides = array<i32>} : memref<104x128xf32, #tpu.memory_space<vmem>>, vector<32x128xf32>,
    } else {
    }
    return
  }
  func.func @transform_0(%arg0: i32, %arg1: i32) -> (i32, i32) {
    %c0_i32 = arith.constant 0 : i32
    %c0_i32_0 = arith.constant 0 : i32
    return %c0_i32, %arg0 : i32, i32
  }
  func.func @transform_1(%arg0: i32, %arg1: i32) -> (i32, i32) {
    %c0_i32 = arith.constant 0 : i32
    %c0_i32_0 = arith.constant 0 : i32
    %c0_i32_1 = arith.constant 0 : i32
    return %c0_i32, %c0_i32_0 : i32, i32
  }
  func.func @transform_2(%arg0: i32, %arg1: i32) -> (i32, i32, i32) {
    %c0_i32 = arith.constant 0 : i32
    %c0_i32_0 = arith.constant 0 : i32
    %c0_i32_1 = arith.constant 0 : i32
    return %arg1, %c0_i32, %c0_i32_0 : i32, i32, i32
  }
  func.func @transform_3(%arg0: i32, %arg1: i32) -> (i32, i32, i32, i32) {
    %c0_i32 = arith.constant 0 : i32
    %c0_i32_0 = arith.constant 0 : i32
    %c0_i32_1 = arith.constant 0 : i32
    %c0_i32_2 = arith.constant 0 : i32
    return %arg1, %c0_i32, %c0_i32_0, %c0_i32_1 : i32, i32, i32, i32
  }
  func.func @transform_4(%arg0: i32, %arg1: i32) -> (i32, i32, i32) {
    %c0_i32 = arith.constant 0 : i32
    %c0_i32_0 = arith.constant 0 : i32
    %c0_i32_1 = arith.constant 0 : i32
    return %arg1, %c0_i32, %c0_i32_0 : i32, i32, i32
  }
  func.func @transform_5(%arg0: i32, %arg1: i32) -> (i32, i32) {
    %c0_i32 = arith.constant 0 : i32
    %c0_i32_0 = arith.constant 0 : i32
    return %c0_i32, %arg0 : i32, i32
  }
}

</mosaic_0001>

<bundles_post_ra>
// kernel: dense_block.1
= control target key start
LH: loop header
LB: loop body
LE: loop exit
PB: predicated region body
PF: predicated region fallthrough
CT: control target
= control target key end

     0   :  { %s1372_s18 = smov 0   ;;  %s1374_s19 = smov 0   ;;  %s1601_s0 = inlined_call_operand.vmem [shape: f32[8,256], index: 0, kind: input, shape index: {}]   ;;  %s1602_s1 = inlined_call_operand.vmem [shape: f32[2,128], index: 1, kind: input, shape index: {}]   ;;  %s1603_s2 = inlined_call_operand.vmem [shape: f32[3,72,2], index: 2, kind: input, shape index: {}]   ;;  %s1604_s3 = inlined_call_operand.vmem [shape: f32[3,3,32,72], index: 3, kind: input, shape index: {}]   ;;  %s1605_s4 = inlined_call_operand.vmem [shape: f32[3,32,1], index: 4, kind: input, shape index: {}]   ;;  %s1606_s5 = inlined_call_operand.vmem [shape: f32[104,256], index: 5, kind: output, shape index: {}]  }
   0x1   :  { %s1376_s20 = smov 0   ;;  %s1378_s21 = smov 0  }
   0x2   :  { %s1380_s22 = smov 0   ;;  %s1382_s23 = smov 0  }
   0x3   :  { %s1384_s24 = smov 0  }
   0x4 LB: > { %1609 = sst [smem:[#allocation3_spill]] %s1331_s23  ;;  %s24_s25 = sadd.s32 1, %s1327_s22  ;;  %s1335_s24 = sphi %s1384_s24, %s15_s24   ;;  %s1331_s23 = sphi %s1382_s23, %s1615_s23   ;;  %s1327_s22 = sphi %s1380_s22, %s1619_s22   ;;  %s1323_s21 = sphi %s1378_s21, %s1613_s21   ;;  %s1319_s20 = sphi %s1376_s20, %s1618_s20   ;;  %s1315_s19 = sphi %s1374_s19, %s1617_s19   ;;  %s1311_s18 = sphi %s1372_s18, %s1616_s18  }
   0x5   : > { %p25_p0 = scmp.ge.s32.totalorder %s24_s25, 3  ;;  %s27_s26 = sadd.s32 1, %s1331_s23 }
   0x6   : > { %s1044_s27 = sadd.s32 4294967295, %s1335_s24   ;;  %p169_p1 = scmp.ne.s32.totalorder %s1315_s19, %s1311_s18 }
   0x7   : > { %s1621_s25 = smov (%p25_p0, %s24_s25), 0  ;;  %s1623_s26 = smov (!%p25_p0, %s27_s26), %s1331_s23 }
   0x8   : > { %1610 = sst [smem:[#allocation4_spill]] %s1621_s25  ;;  %p170_p2 = scmp.eq.s32.totalorder %s1044_s27, 5 }
   0x9   : > { %p1048_p3 = scmp.ge.s32.totalorder %s1335_s24, 1  ;;  %p29_p4 = scmp.ge.s32.totalorder %s1623_s26, 2 }
   0xa   : > { %p228_p5 = scmp.lt.s32.totalorder %s1335_s24, 7  ;;  %p1414_p6 = por %p170_p2, %p169_p1 }
   0xb   : > { %s1625_s26 = smov (%p29_p4, %s1623_s26), 0  ;;  %s159_s30 = sadd.s32 1, %s1315_s19 }
   0xc   : > { %1612 = sst [smem:[#allocation5_spill]] %s1625_s26  ;;  %p229_p7 = pnand %p1048_p3, %p228_p5 }
   0xd   : > { %s156_s29 = ssub.s32 %s1331_s23, %s1625_s26  ;;  %s266_s7 = sand.u32 (!%p229_p7), 1, %s1311_s18  }
   0xe   : > { %p157_p8 = scmp.eq.s32.totalorder %s156_s29, 0  ;;  %232 = sbr.rel (%p229_p7) target bundleno = 575 (0x23f), region = 40 }
   0xf   : > { %p269_p9 = scmp.lt.s32.totalorder (!%p229_p7), %s1323_s21, 1  ;;  %s1205_s8 = smul.u32 (!%p229_p7), 104, %s266_s7 }
  0x10   : > { %s1424_s6 = scalar_select %p157_p8, %s1315_s19, %s159_s30  }
  0x11   : > { %p273_p10 = scmp.lt.s32.totalorder (!%p229_p7), %s1319_s20, 2  ;;  %p1054_p11 = scmp.ne.s32.totalorder (!%p229_p7), %s1319_s20, 0 }
  0x13   : > { %s270_s9 = scalar_select %p269_p9, %s1323_s21, 1 }
  0x14   : > { %s274_s14 = scalar_select %p273_p10, %s1319_s20, 2 }
  0x15   : > { %s1049_s10 = sshll.u32 %s270_s9, 3  ;;  %291 = sbr.rel (%p1054_p11) target bundleno = 34 (0x22), region = 44 }
  0x16   : > { %s272_s13 = scalar_lea.vmem %s1601_s0, %s1049_s10  ;;  %s1206_s15 = smul.u32 72, %s274_s14 }
  0x17   : > { %s1075_s16 = sshll.u32 %s274_s14, 5  ;;  %s1207_s17 = smul.u32 96, %s274_s14 }
  0x18   : > { %s1436_s18 = scalar_lea.vmem %s1605_s4, %s1075_s16  ;;  %s1441_s7 = scalar_lea.vmem %s1603_s2, %s1206_s15 }
  0x19   : > { %s1446_s23 = scalar_lea.vmem %s1604_s3, %s1207_s17  ;;  %s1448_s10 = scalar_lea.vmem [#allocation2], %s1205_s8 }
  0x1a   : > { %v305_v0 = vld [vmem:[%s272_s13] sm:$0xff]  ;;  %v1337_v1 = vmov 0.0  }
  0x1b   : > { %293 = vst [vmem:[%s1448_s10 + $0x8] sm:$0xff] %v1337_v1  ;;  %294 = vst [vmem:[%s1448_s10 + $0x10] sm:$0xff] %v1337_v1 }
  0x1c   : > { %295 = vst [vmem:[%s1448_s10 + $0x18] sm:$0xff] %v1337_v1  ;;  %296 = vst [vmem:[%s1448_s10 + $0x20] sm:$0xff] %v1337_v1 }
  0x1d   : > { %297 = vst [vmem:[%s1448_s10 + $0x28] sm:$0xff] %v1337_v1  ;;  %298 = vst [vmem:[%s1448_s10 + $0x30] sm:$0xff] %v1337_v1 }
  0x1e   : > { %299 = vst [vmem:[%s1448_s10 + $0x38] sm:$0xff] %v1337_v1  ;;  %300 = vst [vmem:[%s1448_s10 + $0x40] sm:$0xff] %v1337_v1 }
  0x1f   : > { %301 = vst [vmem:[%s1448_s10 + $0x48] sm:$0xff] %v1337_v1  ;;  %302 = vst [vmem:[%s1448_s10 + $0x50] sm:$0xff] %v1337_v1 }
  0x20   : > { %303 = vst [vmem:[%s1448_s10 + $0x58] sm:$0xff] %v1337_v1  ;;  %304 = vst [vmem:[%s1448_s10 + $0x60] sm:$0xff] %v1337_v1 }
  0x21   : > { %306 = vst [vmem:[%s1448_s10] sm:$0xff] %v305_v0 }
  0x22 PF: > { %v315_v2 = vld [vmem:[%s1441_s7 + $0x40] sm:$0xff]  ;;  %v314_v3 = vld [vmem:[%s1441_s7 + $0x38] sm:$0xff]  ;;  %v1338_v4 = vmov 1   ;;  %v313_v6 = vld [vmem:[%s1441_s7 + $0x30] sm:$0xff]  ;;  %v1339_v7 = vmov 0   ;;  %s1340_s25 = smov 1  }
  0x23   : > { %1271 = vset.pattern.permute.xlu0 %v1338_v4  ;;  %1269 = vset.pattern.permute.xlu1 %v1338_v4  ;;  %v311_v5 = vld [vmem:[%s1441_s7 + $0x20] sm:$0xff]  ;;  %v312_v8 = vld [vmem:[%s1441_s7 + $0x28] sm:$0xff]  ;;  %v310_v10 = vld [vmem:[%s1441_s7 + $0x18] sm:$0xff]  ;;  %vm509_vm0 = vcmask 588800   ;;  %s1341_s26 = smov 127  }
  0x24   : > { %412 = vperm.xlu1 %1269, %v315_v2   ;;  %408 = vperm.xlu0 %1271, %v314_v3   ;;  %v308_v9 = vld [vmem:[%s1441_s7 + $0x8] sm:$0xff]  ;;  %v309_v11 = vld [vmem:[%s1441_s7 + $0x10] sm:$0xff]  ;;  %v307_v12 = vld [vmem:[%s1441_s7] sm:$0xff] }
  0x25   : > { %v324_v17 = vld [vmem:[%s1448_s10 + $0x40] sm:$0xff]  ;;  %v322_v20 = vld [vmem:[%s1448_s10 + $0x30] sm:$0xff]  ;;  %v323_v22 = vld [vmem:[%s1448_s10 + $0x38] sm:$0xff] }
  0x26   : > { %v321_v26 = vld [vmem:[%s1448_s10 + $0x28] sm:$0xff]  ;;  %v320_v31 = vld [vmem:[%s1448_s10 + $0x20] sm:$0xff]  ;;  %v319_v46 = vld [vmem:[%s1448_s10 + $0x18] sm:$0xff] }
  0x27   : > { %v317_v47 = vld [vmem:[%s1448_s10 + $0x8] sm:$0xff]  ;;  %v318_v50 = vld [vmem:[%s1448_s10 + $0x10] sm:$0xff]  ;;  %v501_v54 = vld [vmem:[%s1446_s23 + $0x20] sm:$0xff] }
  0x28   : > { %1270 = vset.pattern.permute.xlu1 %v1339_v7  ;;  %396 = vperm.xlu0 %1271, %v311_v5   ;;  %v497_v63 = vld [vmem:[%s1446_s23] sm:$0xff] }
  0x29   : > { %357 = vperm.xlu1 %1270, %v313_v6   ;;  %1133 = vmatprep.mubr.msk.f32.mxu0 %vm509_vm0, %v501_v54  ;;  %v316_v0 = vld [vmem:[%s1448_s10] sm:$0xff]  ;;  %v507_v54 = vld [vmem:[%s1446_s23 + $0x50] sm:$0xff] }
  0x2a   : > { %1157 = vmatprep.mubr.msk.f32.mxu1 %vm509_vm0, %v497_v63 }
  0x2c   : > { %1274 = vset.pattern.permute.xlu0 %v1339_v7 }
  0x2d   : > { %352 = vperm.xlu1 %1270, %v312_v8   ;;  %367 = vperm.xlu0 %1274, %v315_v2  }
  0x31   : > { %1272 = vset.pattern.permute.xlu1 %v1338_v4  ;;  %362 = vperm.xlu0 %1274, %v314_v3  }
  0x32   : > { %404 = vperm.xlu1 %1272, %v313_v6   ;;  %v503_v6 = vld [vmem:[%s1446_s23 + $0x30] sm:$0xff] }
  0x35   : > { %347 = vperm.xlu0 %1274, %v311_v5   ;;  %v502_v5 = vld [vmem:[%s1446_s23 + $0x28] sm:$0xff] }
  0x36   : > { %400 = vperm.xlu1 %1272, %v312_v8   ;;  %v505_v8 = vld [vmem:[%s1446_s23 + $0x40] sm:$0xff] }
  0x39   : > { %332 = vperm.xlu0 %1274, %v308_v9  }
  0x3a   : > { %1273 = vset.pattern.permute.xlu1 %v1339_v7 }
  0x3b   : > { %342 = vperm.xlu1 %1273, %v310_v10  }
  0x3d   : > { %1277 = vset.pattern.permute.xlu0 %v1338_v4 }
  0x3e   : > { %384 = vperm.xlu0 %1277, %v308_v9   ;;  %v806_v9 = vld [vmem:[%s1436_s18 + $0x8] sm:$0xff] }
  0x3f   : > { %337 = vperm.xlu1 %1273, %v309_v11  }
  0x42   : > { %1280 = vset.pattern.permute.xlu0 %v1339_v7 }
  0x43   : > { %1275 = vset.pattern.permute.xlu1 %v1338_v4 }
  0x44   : > { %392 = vperm.xlu1 %1275, %v310_v10   ;;  %v805_v10 = vld [vmem:[%s1436_s18] sm:$0xff] }
  0x48   : > { %388 = vperm.xlu1 %1275, %v309_v11   ;;  %v807_v11 = vld [vmem:[%s1436_s18 + $0x10] sm:$0xff] }
  0x4c   : > { %1276 = vset.pattern.permute.xlu1 %v1339_v7 }
  0x4d   : > { %327 = vperm.xlu1 %1276, %v307_v12  }
  0x51   : > { %1278 = vset.pattern.permute.xlu1 %v1338_v4 }
  0x52   : > { %380 = vperm.xlu1 %1278, %v307_v12   ;;  %v808_v12 = vld [vmem:[%s1436_s18 + $0x18] sm:$0xff] }
  0x56   : > { %1279 = vset.pattern.permute.xlu1 %v1339_v7  ;;  %v504_v7 = vld [vmem:[%s1446_s23 + $0x38] sm:$0xff] }
  0x9f   : > { %v413_v13 = vpop.permute.xlu1 %412  ;;  %v409_v14 = vpop.permute.xlu0 %408 }
  0xa3   : > { %v397_v15 = vpop.permute.xlu0 %396 }
  0xa4   : > { %v358_v16 = vpop.permute.xlu1 %357 }
  0xa5   : > { %v376_v24 = vmul.f32 %v358_v16, %v322_v20 }
  0xa8   : > { %v353_v18 = vpop.permute.xlu1 %352  ;;  %v368_v19 = vpop.permute.xlu0 %367 }
  0xa9   : > { %v378_v21 = vmul.f32 %v368_v19, %v324_v17  ;;  %v375_v33 = vmul.f32 %v353_v18, %v321_v26 }
  0xab   : > { %v423_v23 = vadd.f32 %v413_v13, %v378_v21  ;;  %v1055_v13 = vld [vmem:[%s1602_s1] ss:$0 sm:$0xff] }
  0xac   : > { %v363_v25 = vpop.permute.xlu0 %362 }
  0xad   : > { %v1479_v27 = vmax.f32 %v423_v23, 0.0  ;;  %v377_v28 = vmul.f32 %v363_v25, %v323_v22  ;;  %v405_v29 = vpop.permute.xlu1 %404 }
  0xae   : > { %v421_v30 = vadd.f32 %v405_v29, %v376_v24  ;;  %v1056_v29 = vld [vmem:[%s1602_s1 + $0x1] ss:$0 sm:$0xff] }
  0xaf   : > { %v422_v32 = vadd.f32 %v409_v14, %v377_v28  ;;  %1115 = vmatprep.subr.mxu0 %v1479_v27  ;;  %459 = vrot.lane.b32.xlu1 %v1479_v27, %s1340_s25 }
  0xb0   : > { %v430_v34 = vmax.f32 %v421_v30, 0.0  ;;  %1116 = vmatpush3.msra.mxu0 %v1479_v27  ;;  %v348_v35 = vpop.permute.xlu0 %347 }
  0xb1   : > { %v1486_v36 = vmax.f32 %v422_v32, 0.0  ;;  %v374_v37 = vmul.f32 %v348_v35, %v320_v31  ;;  %v401_v38 = vpop.permute.xlu1 %400 }
  0xb2   : > { %v420_v39 = vadd.f32 %v401_v38, %v375_v33 }
  0xb3   : > { %v419_v40 = vadd.f32 %v397_v15, %v374_v37  ;;  %1117 = vmatprep.subr.mxu0 %v1486_v36  ;;  %457 = vrot.lane.b32.xlu0 %v1486_v36, %s1340_s25  ;;  %v499_v37 = vld [vmem:[%s1446_s23 + $0x10] sm:$0xff] }
  0xb4   : > { %v1491_v41 = vmax.f32 %v420_v39, 0.0  ;;  %455 = vrot.lane.b32.xlu1 %v430_v34, %s1340_s25  ;;  %1118 = vmatpush3.msra.mxu0 %v1486_v36  ;;  %v333_v44 = vpop.permute.xlu0 %332 }
  0xb5   : > { %v428_v42 = vmax.f32 %v419_v40, 0.0  ;;  %1119 = vmatprep.subr.mxu0 %v430_v34  ;;  %v371_v49 = vmul.f32 %v333_v44, %v317_v47 }
  0xb6   : > { %1120 = vmatpush3.msra.mxu0 %v430_v34  ;;  %v343_v43 = vpop.permute.xlu1 %342 }
  0xb7   : > { %1121 = vmatprep.subr.mxu0 %v1491_v41  ;;  %453 = vrot.lane.b32.xlu0 %v1491_v41, %s1340_s25  ;;  %v373_v48 = vmul.f32 %v343_v43, %v319_v46 }
  0xb8   : > { %451 = vrot.lane.b32.xlu1 %v428_v42, %s1340_s25  ;;  %1122 = vmatpush3.msra.mxu0 %v1491_v41 }
  0xb9   : > { %1123 = vmatprep.subr.mxu0 %v428_v42  ;;  %v385_v51 = vpop.permute.xlu0 %384 }
  0xba   : > { %1124 = vmatpush3.msra.mxu0 %v428_v42  ;;  %v338_v45 = vpop.permute.xlu1 %337  ;;  %v416_v56 = vadd.f32 %v385_v51, %v371_v49 }
  0xbb   : > { %v372_v55 = vmul.f32 %v338_v45, %v318_v50 }
  0xbc   : > { %v425_v60 = vmax.f32 %v416_v56, 0.0  ;;  %v508_v56 = vld [vmem:[%s1446_s23 + $0x58] sm:$0xff] }
  0xbf   : > { %v393_v52 = vpop.permute.xlu1 %392 }
  0xc0   : > { %v418_v53 = vadd.f32 %v393_v52, %v373_v48  ;;  %v500_v48 = vld [vmem:[%s1446_s23 + $0x18] sm:$0xff] }
  0xc2   : > { %v427_v57 = vmax.f32 %v418_v53, 0.0 }
  0xc3   : > { %v389_v58 = vpop.permute.xlu1 %388 }
  0xc4   : > { %v417_v59 = vadd.f32 %v389_v58, %v372_v55  ;;  %1125 = vmatprep.subr.mxu0 %v427_v57  ;;  %449 = vrot.lane.b32.xlu0 %v427_v57, %s1340_s25  ;;  %v506_v55 = vld [vmem:[%s1446_s23 + $0x48] sm:$0xff] }
  0xc5   : > { %1126 = vmatpush3.msra.mxu0 %v427_v57 }
  0xc6   : > { %v426_v61 = vmax.f32 %v417_v59, 0.0 }
  0xc8   : > { %1127 = vmatprep.subr.mxu0 %v426_v61  ;;  %445 = vrot.lane.b32.xlu0 %v425_v60, %s1340_s25  ;;  %v328_v62 = vpop.permute.xlu1 %327 }
  0xc9   : > { %447 = vrot.lane.b32.xlu1 %v426_v61, %s1340_s25  ;;  %1128 = vmatpush3.msra.mxu0 %v426_v61  ;;  %v370_v1 = vmul.f32 %v328_v62, %v316_v0 }
  0xca   : > { %1129 = vmatprep.subr.mxu0 %v425_v60 }
  0xcb   : > { %1130 = vmatpush3.msra.mxu0 %v425_v60 }
  0xcc   : > { %486 = vrot.lane.b32.xlu0 %v1479_v27, %s1341_s26 }
  0xcd   : > { %v381_v2 = vpop.permute.xlu1 %380 }
  0xce   : > { %v415_v3 = vadd.f32 %v381_v2, %v370_v1 }
  0xd0   : > { %v424_v4 = vmax.f32 %v415_v3, 0.0  ;;  %482 = vrot.lane.b32.xlu0 %v430_v34, %s1341_s26 }
  0xd2   : > { %443 = vrot.lane.b32.xlu1 %v424_v4, %s1340_s25  ;;  %1131 = vmatprep.subr.mxu0 %v424_v4 }
  0xd3   : > { %1132 = vmatpush3.msra.mxu0 %v424_v4 }
  0xd4   : > { %478 = vrot.lane.b32.xlu0 %v428_v42, %s1341_s26  ;;  %1134 = vmatmul.mubr.msk.f32.vlgmr.msra.gmra.mxu0 %vm509_vm0, %v502_v5 }
  0xd5   : > { %1136 = vmatprep.mubr.msk.f32.mxu0 %vm509_vm0, %v503_v6 }
  0xd6   : > { %484 = vrot.lane.b32.xlu1 %v1486_v36, %s1341_s26  ;;  %v498_v36 = vld [vmem:[%s1446_s23 + $0x8] sm:$0xff] }
  0xd8   : > { %474 = vrot.lane.b32.xlu0 %v426_v61, %s1341_s26  ;;  %1137 = vmatmul.mubr.msk.f32.gmra.mxu0 %vm509_vm0, %v504_v7 }
  0xd9   : > { %1181 = vmatprep.mubr.msk.f32.mxu0 %vm509_vm0, %v505_v8 }
  0xda   : > { %480 = vrot.lane.b32.xlu1 %v1491_v41, %s1341_s26 }
  0xdc   : > { %470 = vrot.lane.b32.xlu0 %v424_v4, %s1341_s26 }
  0xde   : > { %476 = vrot.lane.b32.xlu1 %v427_v57, %s1341_s26 }
  0xe0   : > { %816 = vperm.xlu0 %1280, %v806_v9  }
  0xe2   : > { %472 = vrot.lane.b32.xlu1 %v425_v60, %s1341_s26 }
  0xe6   : > { %811 = vperm.xlu1 %1279, %v805_v10  }
  0xea   : > { %821 = vperm.xlu1 %1279, %v807_v11  }
  0xee   : > { %826 = vperm.xlu1 %1279, %v808_v12  }
 0x121   : > { %v460_v14 = vpop.permute.xlu1 %459 }
 0x122   : > { %v469_v15 = vmul.f32 %v1055_v13, %v460_v14 }
 0x124   : > { %1139 = vmatprep.subr.mxu1 %v469_v15 }
 0x125   : > { %v458_v16 = vpop.permute.xlu0 %457  ;;  %1140 = vmatpush3.msra.mxu1 %v469_v15 }
 0x126   : > { %v468_v17 = vmul.f32 %v1055_v13, %v458_v16  ;;  %v456_v18 = vpop.permute.xlu1 %455 }
 0x127   : > { %v467_v19 = vmul.f32 %v1055_v13, %v456_v18 }
 0x128   : > { %1141 = vmatprep.subr.mxu1 %v468_v17 }
 0x129   : > { %v454_v20 = vpop.permute.xlu0 %453  ;;  %1142 = vmatpush3.msra.mxu1 %v468_v17 }
 0x12a   : > { %v466_v21 = vmul.f32 %v1055_v13, %v454_v20  ;;  %v452_v22 = vpop.permute.xlu1 %451  ;;  %1143 = vmatprep.subr.mxu1 %v467_v19 }
 0x12b   : > { %1144 = vmatpush3.msra.mxu1 %v467_v19  ;;  %v465_v23 = vmul.f32 %v1055_v13, %v452_v22 }
 0x12c   : > { %1145 = vmatprep.subr.mxu1 %v466_v21 }
 0x12d   : > { %1146 = vmatpush3.msra.mxu1 %v466_v21 }
 0x12e   : > { %1147 = vmatprep.subr.mxu1 %v465_v23 }
 0x12f   : > { %1148 = vmatpush3.msra.mxu1 %v465_v23 }
 0x136   : > { %v450_v24 = vpop.permute.xlu0 %449 }
 0x137   : > { %v464_v25 = vmul.f32 %v1055_v13, %v450_v24 }
 0x139   : > { %1149 = vmatprep.subr.mxu1 %v464_v25 }
 0x13a   : > { %v446_v26 = vpop.permute.xlu0 %445  ;;  %1150 = vmatpush3.msra.mxu1 %v464_v25 }
 0x13b   : > { %v448_v27 = vpop.permute.xlu1 %447  ;;  %v462_v30 = vmul.f32 %v1055_v13, %v446_v26 }
 0x13c   : > { %v463_v28 = vmul.f32 %v1055_v13, %v448_v27 }
 0x13e   : > { %1151 = vmatprep.subr.mxu1 %v463_v28  ;;  %v487_v31 = vpop.permute.xlu0 %486 }
 0x13f   : > { %v496_v32 = vmul.f32 %v1056_v29, %v487_v31  ;;  %1152 = vmatpush3.msra.mxu1 %v463_v28 }
 0x140   : > { %1153 = vmatprep.subr.mxu1 %v462_v30 }
 0x141   : > { %1154 = vmatpush3.msra.mxu1 %v462_v30  ;;  %1163 = vmatprep.subr.mxu0 %v496_v32 }
 0x142   : > { %v483_v33 = vpop.permute.xlu0 %482  ;;  %1164 = vmatpush3.msra.mxu0 %v496_v32 }
 0x143   : > { %v494_v41 = vmul.f32 %v1056_v29, %v483_v33 }
 0x144   : > { %v444_v34 = vpop.permute.xlu1 %443 }
 0x145   : > { %v461_v35 = vmul.f32 %v1055_v13, %v444_v34 }
 0x146   : > { %v479_v38 = vpop.permute.xlu0 %478 }
 0x147   : > { %1155 = vmatprep.subr.mxu1 %v461_v35  ;;  %v492_v45 = vmul.f32 %v1056_v29, %v479_v38 }
 0x148   : > { %1156 = vmatpush3.msra.mxu1 %v461_v35  ;;  %v485_v39 = vpop.permute.xlu1 %484 }
 0x149   : > { %v495_v40 = vmul.f32 %v1056_v29, %v485_v39  ;;  %1158 = vmatmul.mubr.msk.f32.vlgmr.msra.gmra.mxu1 %vm509_vm0, %v498_v36  ;;  %1187 = vmatprep.subr.mxu1 %v496_v32 }
 0x14a   : > { %1196 = vmatpush3.msra.mxu1 %v496_v32  ;;  %1160 = vmatprep.mubr.msk.f32.mxu1 %vm509_vm0, %v499_v37  ;;  %v475_v44 = vpop.permute.xlu0 %474 }
 0x14b   : > { %1165 = vmatprep.subr.mxu0 %v495_v40  ;;  %1188 = vmatprep.subr.mxu1 %v495_v40  ;;  %v490_v49 = vmul.f32 %v1056_v29, %v475_v44 }
 0x14c   : > { %1166 = vmatpush3.msra.mxu0 %v495_v40  ;;  %1197 = vmatpush3.msra.mxu1 %v495_v40  ;;  %v481_v42 = vpop.permute.xlu1 %480 }
 0x14d   : > { %v493_v43 = vmul.f32 %v1056_v29, %v481_v42  ;;  %1167 = vmatprep.subr.mxu0 %v494_v41  ;;  %1189 = vmatprep.subr.mxu1 %v494_v41 }
 0x14e   : > { %1168 = vmatpush3.msra.mxu0 %v494_v41  ;;  %1198 = vmatpush3.msra.mxu1 %v494_v41  ;;  %v471_v50 = vpop.permute.xlu0 %470 }
 0x14f   : > { %1169 = vmatprep.subr.mxu0 %v493_v43  ;;  %1190 = vmatprep.subr.mxu1 %v493_v43  ;;  %v488_v53 = vmul.f32 %v1056_v29, %v471_v50 }
 0x150   : > { %1170 = vmatpush3.msra.mxu0 %v493_v43  ;;  %1199 = vmatpush3.msra.mxu1 %v493_v43  ;;  %v477_v46 = vpop.permute.xlu1 %476 }
 0x151   : > { %v491_v47 = vmul.f32 %v1056_v29, %v477_v46  ;;  %1171 = vmatprep.subr.mxu0 %v492_v45  ;;  %1191 = vmatprep.subr.mxu1 %v492_v45 }
 0x152   : > { %1172 = vmatpush3.msra.mxu0 %v492_v45  ;;  %1200 = vmatpush3.msra.mxu1 %v492_v45 }
 0x153   : > { %1173 = vmatprep.subr.mxu0 %v491_v47  ;;  %1192 = vmatprep.subr.mxu1 %v491_v47 }
 0x154   : > { %1174 = vmatpush3.msra.mxu0 %v491_v47  ;;  %1201 = vmatpush3.msra.mxu1 %v491_v47  ;;  %v473_v51 = vpop.permute.xlu1 %472 }
 0x155   : > { %v489_v52 = vmul.f32 %v1056_v29, %v473_v51  ;;  %1161 = vmatmul.mubr.msk.f32.gmra.mxu1 %vm509_vm0, %v500_v48  ;;  %1175 = vmatprep.subr.mxu0 %v490_v49 }
 0x156   : > { %1193 = vmatprep.subr.mxu1 %v490_v49  ;;  %1176 = vmatpush3.msra.mxu0 %v490_v49 }
 0x157   : > { %1202 = vmatpush3.msra.mxu1 %v490_v49  ;;  %1177 = vmatprep.subr.mxu0 %v489_v52 }
 0x158   : > { %1194 = vmatprep.subr.mxu1 %v489_v52  ;;  %1178 = vmatpush3.msra.mxu0 %v489_v52 }
 0x159   : > { %1203 = vmatpush3.msra.mxu1 %v489_v52  ;;  %1179 = vmatprep.subr.mxu0 %v488_v53 }
 0x15a   : > { %1195 = vmatprep.subr.mxu1 %v488_v53  ;;  %1180 = vmatpush3.msra.mxu0 %v488_v53 }
 0x15b   : > { %1204 = vmatpush3.msra.mxu1 %v488_v53  ;;  %1184 = vmatprep.mubr.msk.f32.mxu1 %vm509_vm0, %v507_v54  ;;  %v817_v5 = vpop.permute.xlu0 %816 }
 0x15c   : > { %1182 = vmatmul.mubr.msk.f32.vlgmr.msra.gmra.mxu0 %vm509_vm0, %v506_v55  ;;  %1185 = vmatmul.mubr.msk.f32.vlgmr.msra.gmra.mxu1 %vm509_vm0, %v508_v56 }
 0x161   : > { %v812_v59 = vpop.permute.xlu1 %811 }
 0x165   : > { %v822_v0 = vpop.permute.xlu1 %821 }
 0x169   : > { %v827_v10 = vpop.permute.xlu1 %826 }
 0x194   : > { %v1135_v57 = vpop.f32.mrf.mxu0 }
 0x196   : > { %v588_v60 = vpop.f32.mrf.mxu0 }
 0x198   : > { %v1138_v62 = vpop.f32.mrf.mxu0 }
 0x19a   : > { %v598_v1 = vpop.f32.mrf.mxu0 }
 0x209   : > { %v1159_v58 = vpop.f32.mrf.mxu1 }
 0x20a   : > { %v691_v3 = vadd.f32 %v1159_v58, %v1135_v57 }
 0x20b   : > { %v685_v61 = vpop.f32.mrf.mxu1 }
 0x20c   : > { %v686_v8 = vadd.f32 %v685_v61, %v588_v60 }
 0x215   : > { %v1162_v63 = vpop.f32.mrf.mxu1 }
 0x216   : > { %v701_v4 = vadd.f32 %v1162_v63, %v1138_v62 }
 0x217   : > { %v695_v2 = vpop.f32.mrf.mxu1 }
 0x218   : > { %v696_v9 = vadd.f32 %v695_v2, %v598_v1 }
 0x21c   : > { %v1183_v6 = vpop.f32.mrf.mxu0  ;;  %v1186_v7 = vpop.f32.mrf.mxu1 }
 0x21d   : > { %v802_v11 = vadd.f32 %v1183_v6, %v691_v3  ;;  %v804_v12 = vadd.f32 %v1186_v7, %v701_v4  ;;  %835 = sbr.rel (%p1054_p11) target bundleno = 548 (0x224), region = 48 }
 0x21e   : > { %v782_v13 = vpop.f32.mrf.mxu0  ;;  %v792_v14 = vpop.f32.mrf.mxu1 }
 0x21f   : > { %v832_v15 = vadd.f32 %v827_v10, %v804_v12  ;;  %v830_v16 = vadd.f32 %v817_v5, %v802_v11  ;;  %v801_v17 = vadd.f32 %v782_v13, %v686_v8  ;;  %v803_v18 = vadd.f32 %v792_v14, %v696_v9 }
 0x221   : > { %v829_v19 = vadd.f32 %v812_v59, %v801_v17  ;;  %v831_v20 = vadd.f32 %v822_v0, %v803_v18 }
 0x222   : > { %837 = vst [vmem:[%s1448_s10 + $0x10] sm:$0xff] %v830_v16  ;;  %839 = vst [vmem:[%s1448_s10 + $0x20] sm:$0xff] %v832_v15 }
 0x223   : > { %836 = vst [vmem:[%s1448_s10 + $0x8] sm:$0xff] %v829_v19  ;;  %838 = vst [vmem:[%s1448_s10 + $0x18] sm:$0xff] %v831_v20 }
 0x224 PF: > { %p1070_p12 = scmp.ne.s32.totalorder %s1319_s20, 1 }
 0x226   : > { %843 = sbr.rel (%p1070_p12) target bundleno = 557 (0x22d), region = 52 }
 0x22b   : > { %844 = vst [vmem:[%s1448_s10 + $0x28] sm:$0xff] %v829_v19  ;;  %845 = vst [vmem:[%s1448_s10 + $0x30] sm:$0xff] %v830_v16 }
 0x22c   : > { %846 = vst [vmem:[%s1448_s10 + $0x38] sm:$0xff] %v831_v20  ;;  %847 = vst [vmem:[%s1448_s10 + $0x40] sm:$0xff] %v832_v15 }
 0x22d PF: > { %p1071_p13 = scmp.ne.s32.totalorder %s1319_s20, 2 }
 0x22f   : > { %851 = sbr.rel (%p1071_p13) target bundleno = 566 (0x236), region = 56 }
 0x234   : > { %852 = vst [vmem:[%s1448_s10 + $0x48] sm:$0xff] %v829_v19  ;;  %853 = vst [vmem:[%s1448_s10 + $0x50] sm:$0xff] %v830_v16 }
 0x235   : > { %854 = vst [vmem:[%s1448_s10 + $0x58] sm:$0xff] %v831_v20  ;;  %855 = vst [vmem:[%s1448_s10 + $0x60] sm:$0xff] %v832_v15 }
 0x236 PF: > { %862 = sbr.rel (!%p1414_p6) target bundleno = 575 (0x23f), region = 60  ;;  %s1072_s20 = sshll.u32 (%p1414_p6), %s1323_s21, 3  ;;  %v917_v21 = vld [vmem:[%s1448_s10] sm:$0xff] (%p1414_p6)  ;;  %v919_v22 = vld [vmem:[%s1448_s10 + $0x8] sm:$0xff] (%p1414_p6)  ;;  %v921_v23 = vld [vmem:[%s1448_s10 + $0x10] sm:$0xff] (%p1414_p6) }
 0x237   : > { %s864_s15 = scalar_lea.vmem (%p1414_p6), %s1606_s5, %s1072_s20  ;;  %v923_v24 = vld [vmem:[%s1448_s10 + $0x18] sm:$0xff] (%p1414_p6)  ;;  %v925_v25 = vld [vmem:[%s1448_s10 + $0x20] sm:$0xff] (%p1414_p6)  ;;  %v927_v26 = vld [vmem:[%s1448_s10 + $0x28] sm:$0xff] (%p1414_p6) }
 0x238   : > { %918 = vst [vmem:[%s864_s15] sm:$0xff] (%p1414_p6), %v917_v21  ;;  %920 = vst [vmem:[%s864_s15 + $0x10] sm:$0xff] (%p1414_p6), %v919_v22  ;;  %v929_v27 = vld [vmem:[%s1448_s10 + $0x30] sm:$0xff] (%p1414_p6)  ;;  %v931_v28 = vld [vmem:[%s1448_s10 + $0x38] sm:$0xff] (%p1414_p6) }
 0x239   : > { %922 = vst [vmem:[%s864_s15 + $0x20] sm:$0xff] (%p1414_p6), %v921_v23  ;;  %924 = vst [vmem:[%s864_s15 + $0x30] sm:$0xff] (%p1414_p6), %v923_v24  ;;  %v933_v29 = vld [vmem:[%s1448_s10 + $0x40] sm:$0xff] (%p1414_p6) }
 0x23a   : > { %926 = vst [vmem:[%s864_s15 + $0x40] sm:$0xff] (%p1414_p6), %v925_v25  ;;  %928 = vst [vmem:[%s864_s15 + $0x50] sm:$0xff] (%p1414_p6), %v927_v26 }
 0x23b   : > { %930 = vst [vmem:[%s864_s15 + $0x60] sm:$0xff] %v929_v27  ;;  %932 = vst [vmem:[%s864_s15 + $0x70] sm:$0xff] %v931_v28 }
 0x23c   : > { %934 = vst [vmem:[%s864_s15 + $0x80] sm:$0xff] %v933_v29  ;;  %v939_v32 = vld [vmem:[%s1448_s10 + $0x58] sm:$0xff]  ;;  %v941_v33 = vld [vmem:[%s1448_s10 + $0x60] sm:$0xff] }
 0x23d   : > { %v935_v30 = vld [vmem:[%s1448_s10 + $0x48] sm:$0xff]  ;;  %v937_v31 = vld [vmem:[%s1448_s10 + $0x50] sm:$0xff]  ;;  %940 = vst [vmem:[%s864_s15 + $0xb0] sm:$0xff] %v939_v32  ;;  %942 = vst [vmem:[%s864_s15 + $0xc0] sm:$0xff] %v941_v33 }
 0x23e   : > { %936 = vst [vmem:[%s864_s15 + $0x90] sm:$0xff] %v935_v30  ;;  %938 = vst [vmem:[%s864_s15 + $0xa0] sm:$0xff] %v937_v31 }
 0x23f PF: > { %s15_s24 = sadd.s32 1, %s1335_s24   ;;  %s1613_s21 = sld [smem:[#allocation3_spill]] }
 0x240   : > { %p12_p0 = scmp.ge.s32.totalorder %s15_s24, 8   ;;  %s1614_s28 = sld [smem:[#allocation4_spill]] }
 0x241   : > { %s1615_s23 = sld [smem:[#allocation5_spill]]  ;;  %s1616_s18 = smov %s1315_s19 }
 0x242   : > { %s1617_s19 = smov %s1424_s6  ;;  %s1618_s20 = smov %s1327_s22 }
 0x243   :  { %14 = sbr.rel (!%p12_p0) target bundleno = 4 (0x4), region = 133 }
 0x246   : > { %s1619_s22 = smov %s1614_s28 }

</bundles_post_ra>
